<compile_context>
chip_gen: v7x
topology: tpu7x:2x2x1
jax: 0.10.0
libtpu: 0.0.40
codegen_flags: <defaults>
</compile_context>

<pallas_src>
import functools

import jax
import jax.numpy as jnp
from jax.experimental import pallas as pl
from jax.experimental.pallas import tpu as pltpu

_EPS = 1e-5


# ------------------------------ small helpers -------------------------------

def _round_up(v, m):
    return ((v + m - 1) // m) * m


def _vmem_budget_bytes():
    """Generation-aware VMEM budget: ~40 MiB on v7x (64 MiB/TC),
    ~104 MiB on v5e/v6e (128 MiB), with headroom for compiler scratch."""
    cap = 64 * 1024 * 1024
    try:
        info = pltpu.get_tpu_info()
        cap = int(getattr(info, "vmem_capacity_bytes", cap))
    except Exception:
        pass
    return max(32 * 1024 * 1024, cap - 24 * 1024 * 1024)


def _pick_tiles(T, D, Dout, budget):
    """Pick (token_tile, dout_tile).

    Footprint counts: double-buffered x/out tiles, f32 in-kernel intermediates,
    the bf16 normalized-x scratch and the bf16 weight / f32 bias buffers.
    """
    # N (output-feature) tile: keep whole Dout resident if its bf16 weight
    # (double-buffered) stays within ~1/3 of the budget, else stream it in
    # lane-dense (multiple-of-128) chunks over a second grid axis.
    tn = Dout
    while tn > 128 and 2 * D * tn * 2 > budget // 3:
        tn = max(128, _round_up(tn // 2, 128))
    n_tiles = pl.cdiv(Dout, tn)
    wbufs = 1 if n_tiles == 1 else 2

    def footprint(tm):
        return (2 * tm * D * 4                      # x tile, double-buffered (f32)
                + 3 * tm * D * 4                    # f32 LN intermediates (x, xc, y)
                + tm * D * 2                        # bf16 normalized-x scratch
                + 4 * tm * tn * 4                   # out tile (x2 buffers) + f32 matmul result
                + wbufs * (D * tn * 2 + tn * 4))    # bf16 weight + f32 bias buffers

    tm = 1024
    while tm > 8 and footprint(tm) > budget:
        tm //= 2
    tm = max(8, tm)
    # v7x megacore: ensure >=2 token tiles (the "parallel" axis only helps if
    # both TensorCores get work).
    if T > 8:
        tm = min(tm, _round_up(pl.cdiv(T, 2), 8))
    return tm, tn


# ------------------------------ Pallas kernels ------------------------------

def _matmul_kernel(x_ref, w_ref, b_ref, o_ref, y_ref, *, eps, normalize):
    """o = (LayerNorm_no_affine(x) if normalize else x) @ w + b.

    Grid = (token tiles, Dout tiles). The (token_tile, D) normalized/cast
    activations are computed once per token tile (j == 0) into a bf16 VMEM
    scratch and reused for every Dout tile.
    """
    @pl.when(pl.program_id(1) == 0)
    def _():
        x = x_ref[...].astype(jnp.float32)
        if normalize:
            # Two-pass statistics (robust, matches nn.LayerNorm).
            mean = jnp.mean(x, axis=-1, keepdims=True)
            xc = x - mean
            var = jnp.mean(xc * xc, axis=-1, keepdims=True)
            x = xc * jax.lax.rsqrt(var + eps)
        y_ref[...] = x.astype(y_ref.dtype)

    # bf16 MXU operands, f32 accumulation.
    out = jnp.dot(y_ref[...], w_ref[...], preferred_element_type=jnp.float32)
    o_ref[...] = (out + b_ref[...].astype(jnp.float32)).astype(o_ref.dtype)


def _layernorm_kernel(x_ref, g_ref, b_ref, o_ref, *, eps):
    """Standalone tiled LayerNorm (fallback when `fn` is not a fusable Linear)."""
    x = x_ref[...].astype(jnp.float32)
    mean = jnp.mean(x, axis=-1, keepdims=True)
    xc = x - mean
    var = jnp.mean(xc * xc, axis=-1, keepdims=True)
    y = xc * jax.lax.rsqrt(var + eps)
    y = y * g_ref[...].astype(jnp.float32) + b_ref[...].astype(jnp.float32)
    o_ref[...] = y.astype(o_ref.dtype)


# ------------------------------ JAX wrappers --------------------------------

def _matmul_call(x2d, w_bf16, bias, *, normalize, eps=_EPS):
    """Token-tiled, optionally-normalizing matmul.

    No host-side pad/slice: grid = cdiv(T, tile); the ragged last block runs
    the row-independent LayerNorm on unspecified rows whose writes are dropped
    (do NOT add cross-row reductions to the kernel).
    """
    T, D = x2d.shape
    Dout = w_bf16.shape[1]
    budget = _vmem_budget_bytes()
    tm, tn = _pick_tiles(T, D, Dout, budget)
    grid = (pl.cdiv(T, tm), pl.cdiv(Dout, tn))
    bias2 = bias.reshape(1, Dout).astype(jnp.float32)

    kernel = functools.partial(_matmul_kernel, eps=eps, normalize=normalize)

    def build(single_buffer_weights):
        w_kwargs, b_kwargs = {}, {}
        if single_buffer_weights:
            # Grid-invariant operands: halve their VMEM residency.
            w_kwargs = dict(pipeline_mode=pl.Buffered(1))
            b_kwargs = dict(pipeline_mode=pl.Buffered(1))
        return pl.pallas_call(
            kernel,
            out_shape=jax.ShapeDtypeStruct((T, Dout), x2d.dtype),
            grid_spec=pltpu.PrefetchScalarGridSpec(
                num_scalar_prefetch=0,
                grid=grid,
                in_specs=[
                    pl.BlockSpec((tm, D), lambda i, j: (i, 0)),           # x tile
                    pl.BlockSpec((D, tn), lambda i, j: (0, j), **w_kwargs),  # weight
                    pl.BlockSpec((1, tn), lambda i, j: (0, j), **b_kwargs),  # bias
                ],
                out_specs=pl.BlockSpec((tm, tn), lambda i, j: (i, j)),
                scratch_shapes=[pltpu.VMEM((tm, D), jnp.bfloat16)],       # normalized x
            ),
            compiler_params=pltpu.CompilerParams(
                dimension_semantics=("parallel", "arbitrary"),
                vmem_limit_bytes=budget,
            ),
        )

    single = grid[1] == 1
    try:
        return build(single)(x2d, w_bf16, bias2)
    except Exception:
        if not single:
            raise
        # Fallback if single-buffering via pipeline_mode is unsupported.
        return build(False)(x2d, w_bf16, bias2)


def pallas_layernorm(x2d, gamma, beta, *, eps=_EPS):
    """Tiled, pipelined LayerNorm (fallback path for arbitrary `fn`)."""
    T, D = x2d.shape
    budget = _vmem_budget_bytes()
    tm, _ = _pick_tiles(T, D, D, budget)
    g2 = gamma.reshape(1, D).astype(jnp.float32)
    b2 = beta.reshape(1, D).astype(jnp.float32)
    return pl.pallas_call(
        functools.partial(_layernorm_kernel, eps=eps),
        out_shape=jax.ShapeDtypeStruct((T, D), x2d.dtype),
        grid_spec=pltpu.PrefetchScalarGridSpec(
            num_scalar_prefetch=0,
            grid=(pl.cdiv(T, tm),),
            in_specs=[
                pl.BlockSpec((tm, D), lambda i: (i, 0)),
                pl.BlockSpec((1, D), lambda i: (0, 0)),
                pl.BlockSpec((1, D), lambda i: (0, 0)),
            ],
            out_specs=pl.BlockSpec((tm, D), lambda i: (i, 0)),
        ),
        compiler_params=pltpu.CompilerParams(
            dimension_semantics=("parallel",),
            vmem_limit_bytes=budget,
        ),
    )(x2d, g2, b2)


# ------------------------------- module port --------------------------------

class PallasLinear:
    """Deterministic Linear(din -> dout); exposes params so PreNorm can fuse."""

    def __init__(self, w, b):
        self.w = jnp.asarray(w, jnp.float32)         # (Din, Dout)
        self.b = jnp.asarray(b, jnp.float32)         # (Dout,)
        self.w_bf16 = self.w.astype(jnp.bfloat16)    # hoisted MXU-operand cast

    def __call__(self, x2d):
        # Plain (un-normalized) linear — used only on the non-fused path.
        return _matmul_call(x2d, self.w_bf16, self.b, normalize=False)


class PreNorm:
    """Mirrors the PyTorch module: self.fn(self.norm(x), **kwargs)."""

    def __init__(self, dim, fn, dtype=jnp.float32):
        self.dim = dim
        self.fn = fn
        # nn.LayerNorm default affine: weight = ones, bias = zeros.
        self.gamma = jnp.ones((dim,), dtype)
        self.beta = jnp.zeros((dim,), dtype)
        self._folded = None   # cached (gamma-folded bf16 W, beta-folded bias)

    def _folded_linear(self):
        # (y*gamma + beta) @ W + b == y @ (gamma[:,None]*W) + (beta @ W + b),
        # computed once and cached (no per-call HBM convert of the weight).
        if self._folded is None:
            w = self.fn.w.astype(jnp.float32)
            wf = (self.gamma.astype(jnp.float32)[:, None] * w).astype(jnp.bfloat16)
            bf = self.beta.astype(jnp.float32) @ w + self.fn.b.astype(jnp.float32)
            self._folded = (wf, bf)
        return self._folded

    def __call__(self, x, **kwargs):
        B, S, D = x.shape
        x2d = x.reshape(B * S, D)
        if isinstance(self.fn, PallasLinear) and not kwargs:
            # Fused LayerNorm + Linear: one pallas_call, no HBM round trip.
            wf, bf = self._folded_linear()
            out = _matmul_call(x2d, wf, bf, normalize=True)
        else:
            normed = pallas_layernorm(x2d, self.gamma, self.beta)
            out = self.fn(normed, **kwargs)
        return out.reshape(B, S, -1)


# --------------------------------- main -------------------------------------

if __name__ == "__main__":
    B, S, D = 2, 8, 32
    # TODO(synk): production dims should keep D / Dout at multiples of 128
    # (256 on v6e/v7x) or pack several feature groups per tile so output
    # stores are lane-dense (unmasked vst) and MXU columns are filled; the
    # demo D=32 necessarily uses masked partial stores.
    key = jax.random.PRNGKey(0)
    kx, kw, kb = jax.random.split(key, 3)

    x = jax.random.normal(kx, (B, S, D), dtype=jnp.float32)

    # Deterministic "fn": Linear(dim, dim).
    w = jax.random.normal(kw, (D, D), dtype=jnp.float32) * 0.02
    b = jax.random.normal(kb, (D,), dtype=jnp.float32) * 0.02

    prenorm = PreNorm(D, PallasLinear(w, b))
    out = jax.block_until_ready(prenorm(x))

    # Pure-JAX f32 reference (kernel feeds the MXU bf16 operands with f32
    # accumulation, hence the loosened tolerance).
    mean = jnp.mean(x, axis=-1, keepdims=True)
    var = jnp.mean((x - mean) ** 2, axis=-1, keepdims=True)
    ref_norm = (x - mean) * jax.lax.rsqrt(var + _EPS)
    ref = jnp.einsum("bsd,de->bse", ref_norm, w) + b

    assert out.shape == (B, S, D)
    assert jnp.allclose(out, ref, atol=2e-2, rtol=2e-2), float(
        jnp.max(jnp.abs(out - ref)))

    print("KERNEL_OK")
</pallas_src>

<mosaic_0001>
module attributes {stable_mosaic.version = 11 : i64} {
  func.func @_matmul_kernel(%arg0: i32, %arg1: i32, %arg2: memref<8x32xf32, #tpu.memory_space<vmem>>, %arg3: memref<32x32xbf16, #tpu.memory_space<vmem>>, %arg4: memref<1x32xf32, #tpu.memory_space<vmem>>, %arg5: memref<8x32xf32, #tpu.memory_space<vmem>>, %arg6: memref<8x32xbf16, #tpu.memory_space<vmem>>) attributes {dimension_semantics = [#tpu.dimension_semantics<parallel>, #tpu.dimension_semantics<arbitrary>], iteration_bounds = array<i64: 2, 1>, scalar_prefetch = 0 : i64, scratch_operands = 1 : i64, tpu.core_type = #tpu.core_type<tc>, window_params = [{transform_indices = @transform_0, window_bounds = array<i64: 8, 32>}, {pipeline_mode = #tpu.pipeline_mode<synchronous>, transform_indices = @transform_1, window_bounds = array<i64: 32, 32>}, {pipeline_mode = #tpu.pipeline_mode<synchronous>, transform_indices = @transform_2, window_bounds = array<i64: 1, 32>}, {transform_indices = @transform_3, window_bounds = array<i64: 8, 32>}]} {
    %c0_i32 = arith.constant 0 : i32
    %0 = arith.cmpi eq, %arg1, %c0_i32 : i32
    %1 = arith.extui %0 : i1 to i32
    %c0_i32_0 = arith.constant 0 : i32
    %2 = arith.cmpi ne, %1, %c0_i32_0 : i32
    scf.if %2 {
      %c0_8 = arith.constant 0 : index
      %c0_9 = arith.constant 0 : index
      %10 = vector.load %arg2[%c0_8, %c0_9] : memref<8x32xf32, #tpu.memory_space<vmem>>, vector<8x32xf32>
      %cst_10 = arith.constant dense<0.000000e+00> : vector<8xf32>
      %11 = vector.multi_reduction <add>, %10, %cst_10 [1] : vector<8x32xf32> to vector<8xf32>
      %12 = vector.shape_cast %11 : vector<8xf32> to vector<8x1xf32>
      %cst_11 = arith.constant 3.200000e+01 : f32
      %13 = vector.broadcast %cst_11 : f32 to vector<8x1xf32>
      %14 = arith.divf %12, %13 : vector<8x1xf32>
      %15 = vector.broadcast %14 : vector<8x1xf32> to vector<8x32xf32>
      %16 = arith.subf %10, %15 : vector<8x32xf32>
      %17 = arith.mulf %16, %16 : vector<8x32xf32>
      %cst_12 = arith.constant dense<0.000000e+00> : vector<8xf32>
      %18 = vector.multi_reduction <add>, %17, %cst_12 [1] : vector<8x32xf32> to vector<8xf32>
      %19 = vector.shape_cast %18 : vector<8xf32> to vector<8x1xf32>
      %cst_13 = arith.constant 3.200000e+01 : f32
      %20 = vector.broadcast %cst_13 : f32 to vector<8x1xf32>
      %21 = arith.divf %19, %20 : vector<8x1xf32>
      %cst_14 = arith.constant 9.99999974E-6 : f32
      %22 = vector.broadcast %cst_14 : f32 to vector<8x1xf32>
      %23 = arith.addf %21, %22 : vector<8x1xf32>
      %24 = math.rsqrt %23 : vector<8x1xf32>
      %25 = vector.broadcast %24 : vector<8x1xf32> to vector<8x32xf32>
      %26 = arith.mulf %16, %25 : vector<8x32xf32>
      %27 = arith.truncf %26 : vector<8x32xf32> to vector<8x32xbf16>
      %c0_15 = arith.constant 0 : index
      %c0_16 = arith.constant 0 : index
      %28 = vector.load %arg6[%c0_15, %c0_16] : memref<8x32xbf16, #tpu.memory_space<vmem>>, vector<8x32xbf16>
      tpu.vector_store %arg6[%c0_15, %c0_16], %27 {strides = array<i32>} : memref<8x32xbf16, #tpu.memory_space<vmem>>, vector<8x32xbf16>,
    } else {
    }
    %c0 = arith.constant 0 : index
    %c0_1 = arith.constant 0 : index
    %3 = vector.load %arg6[%c0, %c0_1] : memref<8x32xbf16, #tpu.memory_space<vmem>>, vector<8x32xbf16>
    %c0_2 = arith.constant 0 : index
    %c0_3 = arith.constant 0 : index
    %4 = vector.load %arg3[%c0_2, %c0_3] : memref<32x32xbf16, #tpu.memory_space<vmem>>, vector<32x32xbf16>
    %cst = arith.constant dense<0.000000e+00> : vector<8x32xf32>
    %5 = tpu.matmul %3, %4, %cst {dimension_numbers = #tpu.dot_dimension_numbers<[1], [0], [0], [1], [0, 0, 1, 1], [], []>} : vector<8x32xbf16>, vector<32x32xbf16>, vector<8x32xf32> -> vector<8x32xf32>
    %c0_4 = arith.constant 0 : index
    %c0_5 = arith.constant 0 : index
    %6 = vector.load %arg4[%c0_4, %c0_5] : memref<1x32xf32, #tpu.memory_space<vmem>>, vector<1x32xf32>
    %7 = vector.broadcast %6 : vector<1x32xf32> to vector<8x32xf32>
    %8 = arith.addf %5, %7 : vector<8x32xf32>
    %c0_6 = arith.constant 0 : index
    %c0_7 = arith.constant 0 : index
    %9 = vector.load %arg5[%c0_6, %c0_7] : memref<8x32xf32, #tpu.memory_space<vmem>>, vector<8x32xf32>
    tpu.vector_store %arg5[%c0_6, %c0_7], %8 {strides = array<i32>} : memref<8x32xf32, #tpu.memory_space<vmem>>, vector<8x32xf32>,
    return
  }
  func.func @transform_0(%arg0: i32, %arg1: i32) -> (i32, i32) {
    %c0_i32 = arith.constant 0 : i32
    %c0_i32_0 = arith.constant 0 : i32
    return %arg0, %c0_i32 : i32, i32
  }
  func.func @transform_1(%arg0: i32, %arg1: i32) -> (i32, i32) {
    %c0_i32 = arith.constant 0 : i32
    %c0_i32_0 = arith.constant 0 : i32
    return %c0_i32, %arg1 : i32, i32
  }
  func.func @transform_2(%arg0: i32, %arg1: i32) -> (i32, i32) {
    %c0_i32 = arith.constant 0 : i32
    %c0_i32_0 = arith.constant 0 : i32
    return %c0_i32, %arg1 : i32, i32
  }
  func.func @transform_3(%arg0: i32, %arg1: i32) -> (i32, i32) {
    %c0_i32 = arith.constant 0 : i32
    return %arg0, %arg1 : i32, i32
  }
}

module attributes {stable_mosaic.version = 11 : i64} {
  func.func @_matmul_kernel(%arg0: i32, %arg1: i32, %arg2: memref<8x32xf32, #tpu.memory_space<vmem>>, %arg3: memref<32x32xbf16, #tpu.memory_space<vmem>>, %arg4: memref<1x32xf32, #tpu.memory_space<vmem>>, %arg5: memref<8x32xf32, #tpu.memory_space<vmem>>, %arg6: memref<8x32xbf16, #tpu.memory_space<vmem>>) attributes {dimension_semantics = [#tpu.dimension_semantics<parallel>, #tpu.dimension_semantics<arbitrary>], iteration_bounds = array<i64: 2, 1>, scalar_prefetch = 0 : i64, scratch_operands = 1 : i64, tpu.core_type = #tpu.core_type<tc>, window_params = [{transform_indices = @transform_0, window_bounds = array<i64: 8, 32>}, {transform_indices = @transform_1, window_bounds = array<i64: 32, 32>}, {transform_indices = @transform_2, window_bounds = array<i64: 1, 32>}, {transform_indices = @transform_3, window_bounds = array<i64: 8, 32>}]} {
    %c0_i32 = arith.constant 0 : i32
    %0 = arith.cmpi eq, %arg1, %c0_i32 : i32
    %1 = arith.extui %0 : i1 to i32
    %c0_i32_0 = arith.constant 0 : i32
    %2 = arith.cmpi ne, %1, %c0_i32_0 : i32
    scf.if %2 {
      %c0_8 = arith.constant 0 : index
      %c0_9 = arith.constant 0 : index
      %10 = vector.load %arg2[%c0_8, %c0_9] : memref<8x32xf32, #tpu.memory_space<vmem>>, vector<8x32xf32>
      %cst_10 = arith.constant dense<0.000000e+00> : vector<8xf32>
      %11 = vector.multi_reduction <add>, %10, %cst_10 [1] : vector<8x32xf32> to vector<8xf32>
      %12 = vector.shape_cast %11 : vector<8xf32> to vector<8x1xf32>
      %cst_11 = arith.constant 3.200000e+01 : f32
      %13 = vector.broadcast %cst_11 : f32 to vector<8x1xf32>
      %14 = arith.divf %12, %13 : vector<8x1xf32>
      %15 = vector.broadcast %14 : vector<8x1xf32> to vector<8x32xf32>
      %16 = arith.subf %10, %15 : vector<8x32xf32>
      %17 = arith.mulf %16, %16 : vector<8x32xf32>
      %cst_12 = arith.constant dense<0.000000e+00> : vector<8xf32>
      %18 = vector.multi_reduction <add>, %17, %cst_12 [1] : vector<8x32xf32> to vector<8xf32>
      %19 = vector.shape_cast %18 : vector<8xf32> to vector<8x1xf32>
      %cst_13 = arith.constant 3.200000e+01 : f32
      %20 = vector.broadcast %cst_13 : f32 to vector<8x1xf32>
      %21 = arith.divf %19, %20 : vector<8x1xf32>
      %cst_14 = arith.constant 9.99999974E-6 : f32
      %22 = vector.broadcast %cst_14 : f32 to vector<8x1xf32>
      %23 = arith.addf %21, %22 : vector<8x1xf32>
      %24 = math.rsqrt %23 : vector<8x1xf32>
      %25 = vector.broadcast %24 : vector<8x1xf32> to vector<8x32xf32>
      %26 = arith.mulf %16, %25 : vector<8x32xf32>
      %27 = arith.truncf %26 : vector<8x32xf32> to vector<8x32xbf16>
      %c0_15 = arith.constant 0 : index
      %c0_16 = arith.constant 0 : index
      %28 = vector.load %arg6[%c0_15, %c0_16] : memref<8x32xbf16, #tpu.memory_space<vmem>>, vector<8x32xbf16>
      tpu.vector_store %arg6[%c0_15, %c0_16], %27 {strides = array<i32>} : memref<8x32xbf16, #tpu.memory_space<vmem>>, vector<8x32xbf16>,
    } else {
    }
    %c0 = arith.constant 0 : index
    %c0_1 = arith.constant 0 : index
    %3 = vector.load %arg6[%c0, %c0_1] : memref<8x32xbf16, #tpu.memory_space<vmem>>, vector<8x32xbf16>
    %c0_2 = arith.constant 0 : index
    %c0_3 = arith.constant 0 : index
    %4 = vector.load %arg3[%c0_2, %c0_3] : memref<32x32xbf16, #tpu.memory_space<vmem>>, vector<32x32xbf16>
    %cst = arith.constant dense<0.000000e+00> : vector<8x32xf32>
    %5 = tpu.matmul %3, %4, %cst {dimension_numbers = #tpu.dot_dimension_numbers<[1], [0], [0], [1], [0, 0, 1, 1], [], []>} : vector<8x32xbf16>, vector<32x32xbf16>, vector<8x32xf32> -> vector<8x32xf32>
    %c0_4 = arith.constant 0 : index
    %c0_5 = arith.constant 0 : index
    %6 = vector.load %arg4[%c0_4, %c0_5] : memref<1x32xf32, #tpu.memory_space<vmem>>, vector<1x32xf32>
    %7 = vector.broadcast %6 : vector<1x32xf32> to vector<8x32xf32>
    %8 = arith.addf %5, %7 : vector<8x32xf32>
    %c0_6 = arith.constant 0 : index
    %c0_7 = arith.constant 0 : index
    %9 = vector.load %arg5[%c0_6, %c0_7] : memref<8x32xf32, #tpu.memory_space<vmem>>, vector<8x32xf32>
    tpu.vector_store %arg5[%c0_6, %c0_7], %8 {strides = array<i32>} : memref<8x32xf32, #tpu.memory_space<vmem>>, vector<8x32xf32>,
    return
  }
  func.func @transform_0(%arg0: i32, %arg1: i32) -> (i32, i32) {
    %c0_i32 = arith.constant 0 : i32
    %c0_i32_0 = arith.constant 0 : i32
    return %arg0, %c0_i32 : i32, i32
  }
  func.func @transform_1(%arg0: i32, %arg1: i32) -> (i32, i32) {
    %c0_i32 = arith.constant 0 : i32
    %c0_i32_0 = arith.constant 0 : i32
    return %c0_i32, %arg1 : i32, i32
  }
  func.func @transform_2(%arg0: i32, %arg1: i32) -> (i32, i32) {
    %c0_i32 = arith.constant 0 : i32
    %c0_i32_0 = arith.constant 0 : i32
    return %c0_i32, %arg1 : i32, i32
  }
  func.func @transform_3(%arg0: i32, %arg1: i32) -> (i32, i32) {
    %c0_i32 = arith.constant 0 : i32
    return %arg0, %arg1 : i32, i32
  }
}

</mosaic_0001>

<bundles_post_ra>
// kernel: tpu_custom_call.1
= control target key start
LH: loop header
LB: loop body
LE: loop exit
PB: predicated region body
PF: predicated region fallthrough
CT: control target
= control target key end

     0   :  { %8 = vsyncpa [#allocation4], 0  ;;  %s957_s0 = inlined_call_operand.hbm [shape: f32[16,32], index: 0, kind: input, shape index: {}]   ;;  %s958_s1 = inlined_call_operand.hbm [shape: bf16[32,32], index: 1, kind: input, shape index: {}]   ;;  %s959_s2 = inlined_call_operand.vmem [shape: f32[1,32], index: 2, kind: input, shape index: {}]   ;;  %s960_s3 = inlined_call_operand.hbm [shape: f32[16,32], index: 3, kind: output, shape index: {}]  }
   0x1   :  { %10 = vsyncpa [#allocation4 + $0x1], 0 }
   0x2   :  { %11 = vsyncpa [#allocation7], 0 }
   0x3   :  { %12 = vsyncpa [#allocation5], 0 }
   0x4   :  { %14 = vsyncpa [#allocation5 + $0x1], 0  ;;  %s732_s12 = smov 0   ;;  %s734_s13 = smov 0  }
   0x5   :  { %s736_s14 = smov 0   ;;  %s738_s15 = smov 0  }
   0x6   :  { %s740_s16 = smov 0   ;;  %s742_s17 = smov 0  }
   0x7 LB: > { %s447_s18 = sadd.s32 4294967295, %s703_s17   ;;  %s448_s19 = sadd.s32 4294967294, %s703_s17   ;;  %s703_s17 = sphi %s742_s17, %s20_s17   ;;  %s699_s16 = sphi %s740_s16, %s984_s16   ;;  %s695_s15 = sphi %s738_s15, %s983_s15   ;;  %s691_s14 = sphi %s736_s14, %s982_s14   ;;  %s687_s13 = sphi %s734_s13, %s981_s13   ;;  %s683_s12 = sphi %s732_s12, %s980_s12  }
   0x8   : > { %p52_p0 = scmp.ne.s32.totalorder %s687_s13, %s683_s12  ;;  %p766_p1 = scmp.eq.s32.totalorder %s447_s18, 0 }
   0x9   : > { %p770_p2 = scmp.eq.s32.totalorder %s447_s18, 1  ;;  %p136_p3 = scmp.eq.s32.totalorder %s448_s19, 1 }
   0xa   : > { %s965_s20 = scalar_select %p766_p1, 1, 0 }
   0xb   : > { %s966_s21 = scalar_select %p770_p2, 1, 0 }
   0xc   : > { %p776_p4 = por %p766_p1, %p52_p0  ;;  %p449_p5 = scmp.ge.s32.totalorder %s703_s17, 1 }
   0xd   : > { %p781_p6 = por %p136_p3, %p52_p0  ;;  %p143_p7 = scmp.lt.s32.totalorder %s703_s17, 3 }
   0xe   : > { %s967_s22 = scalar_select %p776_p4, 1, 0 }
   0xf   : > { %s968_s23 = scalar_select %p781_p6, 1, 0 }
  0x10   : > { %p786_p8 = pnand %p449_p5, %p143_p7  ;;  %s705_s25 = smov [#allocation6]  }
  0x11   : > { %s157_s26 = sshll.u32 %s705_s25, 4  ;;  %s32_s28 = sadd.s32 1, %s699_s16  ;;  %s158_s26 = int_to_ptr.vmem [resolvable:$true] %s157_s26 }
  0x12   : > { %s969_s24 = scalar_select %p786_p8, 1, 0 }
  0x13   : > { %p486_p9 = pneg %p786_p8  ;;  %s559_s4 = scalar_lea.hbm %s958_s1, 256 }
  0x14   : > { %p560_p12 = scmp.ne.s32.totalorder %s958_s1, %s559_s4  ;;  %p566_p5 = scmp.lt.u32.totalorder %s559_s4, %s958_s1 }
  0x15   : > { %p795_p11 = pnand %p486_p9, %p766_p1 }
  0x17   : > { %p561_p13 = pneg %p795_p11 }
  0x19   : > { %p562_p0 = pnand %p561_p13, %p560_p12 }
  0x1b   : > { %p563_p3 = pneg %p562_p0 }
  0x1d   : > { %p568_p7 = pnand %p566_p5, %p563_p3 }
  0x1f   : > { %571 = shalt.err (!%p568_p7)
}
  0x20   : > { %s572_s9 = scalar_lea.vmem %s158_s26, 256  ;;  %p580_p1 = scmp.lt.s32.totalorder %s158_s26, %s158_s26 }
  0x21   : > { %p573_p9 = scmp.ne.s32.totalorder %s158_s26, %s572_s9  ;;  %p581_p4 = scmp.lt.s32.totalorder %s572_s9, %s572_s9 }
  0x23   : > { %p575_p10 = pnand %p573_p9, %p561_p13  ;;  %p582_p8 = por %p581_p4, %p580_p1 }
  0x25   : > { %p576_p6 = pneg %p575_p10 }
  0x27   : > { %p583_p2 = pnand %p582_p8, %p576_p6 }
  0x29   : > { %586 = shalt.err (!%p583_p2)
}
  0x2a   : > { %s706_s10 = smov 64   ;;  %s707_s11 = smov 4  }
  0x2b   : > { %489 = dma.hbm_to_vmem [thread:$0]  (!%p795_p11), %s958_s1, 256, %s158_s26, [#allocation7], %s706_s10, %s706_s10, %s707_s11  }
  0x2c   : > { %p34_p1 = scmp.ge.s32.totalorder %s32_s28, 2  ;;  %s39_s25 = sadd.s32 1, %s691_s14 }
  0x2d   : > { %p46_p2 = scmp.ne.s32.totalorder %s691_s14, %s687_s13  ;;  %p47_p4 = scmp.eq.s32.totalorder %s703_s17, 0 }
  0x2e   : > { %s986_s28 = smov (%p34_p1, %s32_s28), 0  ;;  %p972_p8 = scmp.ne.s32.totalorder %s966_s21, 0 }
  0x2f   : > { %p822_p6 = por %p47_p4, %p46_p2  ;;  %s36_s27 = ssub.s32 %s699_s16, %s986_s28 }
  0x30   : > { %p828_p10 = por %p972_p8, %p46_p2  ;;  %p499_p12 = scmp.lt.s32.totalorder %s703_s17, 2 }
  0x31   : > { %p37_p11 = scmp.eq.s32.totalorder %s36_s27, 0  ;;  %s177_s26 = sand.u32 1, %s691_s14  }
  0x32   : > { %s453_s4 = sshll.u32 %s177_s26, 3  ;;  %s454_s6 = sshll.u32 %s699_s16, 7 }
  0x33   : > { %s837_s5 = scalar_select %p37_p11, %s691_s14, %s39_s25  }
  0x34   : > { %s843_s9 = scalar_lea.hbm %s957_s0, %s454_s6  ;;  %s181_s21 = scalar_lea.vmem [#allocation3], %s453_s4 }
  0x35   : > { %s188_s10 = sshll.u32 %s181_s21, 4  ;;  %p849_p13 = pnand %p499_p12, %p822_p6  ;;  %s845_s10 = int_to_ptr.vmem [resolvable:$true] %s188_s10 }
  0x36   : > { %s178_s18 = scalar_lea.sflag [#allocation4], %s177_s26  ;;  %s587_s19 = scalar_lea.hbm %s843_s9, 128 }
  0x37   : > { %p588_p0 = scmp.ne.s32.totalorder %s843_s9, %s587_s19  ;;  %p589_p3 = pneg %p849_p13 }
  0x38   : > { %s592_s4 = scalar_lea.hbm %s957_s0, 256  ;;  %p593_p9 = scmp.lt.u32.totalorder %s843_s9, %s957_s0 }
  0x39   : > { %p590_p5 = pnand %p589_p3, %p588_p0  ;;  %p594_p1 = scmp.lt.u32.totalorder %s592_s4, %s587_s19 }
  0x3a   : > { %p596_p4 = scmp.lt.u32.totalorder %s587_s19, %s843_s9 }
  0x3b   : > { %p591_p7 = pneg %p590_p5  ;;  %p595_p2 = por %p594_p1, %p593_p9 }
  0x3d   : > { %p597_p6 = por %p596_p4, %p595_p2 }
  0x3f   : > { %p598_p8 = pnand %p597_p6, %p591_p7 }
  0x41   : > { %601 = shalt.err (!%p598_p8)
}
  0x42   : > { %s602_s26 = scalar_lea.vmem %s845_s10, 128  ;;  %s708_s7 = smov [#allocation3]  }
  0x43   : > { %p603_p12 = scmp.ne.s32.totalorder %s845_s10, %s602_s26  ;;  %s607_s8 = sshll.u32 %s708_s7, 4  ;;  %s608_s8 = int_to_ptr.vmem [resolvable:$false] %s607_s8 }
  0x44   : > { %s609_s21 = scalar_lea.vmem %s608_s8, 256  ;;  %p610_p5 = scmp.lt.s32.totalorder %s845_s10, %s608_s8 }
  0x45   : > { %p605_p11 = pnand %p603_p12, %p589_p3  ;;  %p611_p9 = scmp.lt.s32.totalorder %s609_s21, %s602_s26 }
  0x47   : > { %p606_p0 = pneg %p605_p11  ;;  %p612_p1 = por %p611_p9, %p610_p5 }
  0x49   : > { %p613_p2 = pnand %p612_p1, %p606_p0 }
  0x4b   : > { %616 = shalt.err (!%p613_p2)
}
  0x4c   : > { %493 = dma.hbm_to_vmem [thread:$0]  (!%p849_p13), %s843_s9, 128, %s845_s10, %s178_s18  }
  0x4d   : > { %p975_p7 = scmp.ne.s32.totalorder %s969_s24, 0 }
  0x4e   : > { %s881_s19 = sand.u32 (!%p975_p7), 1, %s687_s13   ;;  %p976_p3 = scmp.ne.s32.totalorder (!%p975_p7), %s967_s22, 0 }
  0x4f   : > { %197 = sbr.rel (%p975_p7) target bundleno = 638 (0x27e), region = 32  ;;  %s456_s25 = sshll.u32 (!%p975_p7), %s881_s19, 3 }
  0x50   : > { %s200_s27 = scalar_lea.sflag (!%p975_p7), [#allocation4], %s881_s19  ;;  %s203_s4 = scalar_lea.vmem (!%p975_p7), [#allocation3], %s456_s25 }
  0x56   : > { %670 = dma.done.wait (%p976_p3), %s200_s27, 128  }
  0x57   : > { %672 = vsyncadd (%p976_p3), %s200_s27, 4294967168  ;;  %p977_p13 = scmp.ne.s32.totalorder %s965_s20, 0 }
  0x59   : > { %674 = dma.done.wait (%p977_p13), [#allocation7], 256  }
  0x5a   : > { %676 = vsyncadd (%p977_p13), [#allocation7], 4294967040  ;;  %vm242_vm0 = vcmask 261120   ;;  %v241_v0 = vld [vmem:[%s203_s4] sm:$0xff]  ;;  %v555_v7 = vld [vmem:[#allocation6] sm:$0xff]   ;;  %v709_v8 = vmov 0.0  }
  0x5b   : > { %v243_v1 = vsel %vm242_vm0, %v241_v0, 0.0  ;;  %470 = vmatprep.subr.bf16.mxu0 %v709_v8  ;;  %v556_v9 = vld [vmem:[#allocation6 + $0x8] sm:$0xff]   ;;  %vm710_vm1 = vmmov 0   ;;  %vm258_vm2 = vcmask 257024   ;;  %s464_s24 = sshll.u32 %s695_s15, 7  ;;  %s232_s9 = scalar_lea.vmem [#allocation8], %s456_s25 }
  0x5c   : > { %244 = vadd.xlane.f32.xlu0 %v243_v1  ;;  %471 = vmatpush3.bf16.msra.mxu0 %v555_v7  ;;  %v459_v17 = vld [vmem:[%s959_s2] ss:$0 sm:$0xff]  ;;  %s344_s10 = sshll.u32 %s232_s9, 4  ;;  %s907_s29 = scalar_lea.hbm %s960_s3, %s464_s24  ;;  %s909_s10 = int_to_ptr.vmem [resolvable:$true] %s344_s10 }
  0x5d   : > { %474 = vmatprep.mubr.msk.bf16.mxu0 %vm710_vm1, %v709_v8  ;;  %472 = vmatprep.subr.bf16.mxu0 %v709_v8  ;;  %s330_s15 = scalar_lea.sflag [#allocation5], %s881_s19  ;;  %s617_s6 = scalar_lea.vmem %s909_s10, 128 }
  0x5e   : > { %p618_p4 = scmp.ne.s32.totalorder %s909_s10, %s617_s6  ;;  %s711_s26 = smov [#allocation8]  }
  0x5f   : > { %s621_s7 = sshll.u32 %s711_s26, 4  ;;  %s622_s7 = int_to_ptr.vmem [resolvable:$false] %s621_s7 }
  0x60   : > { %473 = vmatpush3.bf16.msra.mxu0 %v556_v9  ;;  %p619_p6 = pnand %p618_p4, %p828_p10  ;;  %s623_s8 = scalar_lea.vmem %s622_s7, 256 }
  0x61   : > { %p624_p12 = scmp.lt.s32.totalorder %s909_s10, %s622_s7  ;;  %p625_p11 = scmp.lt.s32.totalorder %s623_s8, %s617_s6 }
  0x62   : > { %p620_p8 = pneg %p619_p6 }
  0x63   : > { %p626_p0 = por %p625_p11, %p624_p12 }
  0x65   : > { %p627_p5 = pnand %p626_p0, %p620_p8 }
  0xe9   : > { %v245_v2 = vpop.xlane.xlu0 %244 }
  0xea   : > { %v247_v3 = vmul.f32 0.03125, %v245_v2 }
  0xec   : > { %v248_v4 = vsub.f32 %v241_v0, %v247_v3 }
  0xee   : > { %v249_v5 = vmul.f32 %v248_v4, %v248_v4 }
  0xf0   : > { %v250_v6 = vsel %vm242_vm0, %v249_v5, 0.0 }
  0xf1   : > { %251 = vadd.xlane.f32.xlu0 %v250_v6 }
 0x17e   : > { %v252_v10 = vpop.xlane.xlu0 %251 }
 0x17f   : > { %v253_v11 = vmul.f32 0.03125, %v252_v10 }
 0x181   : > { %v254_v12 = vadd.f32 1e-05, %v253_v11 }
 0x183   : > { %557 = vrsqrt.f32 %v254_v12 }
 0x18d   : > { %v558_v13 = vpop.eup %557 }
 0x18e   : > { %v256_v14 = vmul.f32 %v558_v13, %v248_v4 }
 0x190   : > { %v257_v15 = vpack.c.bf16 %v256_v14, %v256_v14 }
 0x192   : > { %259 = vst.msk [vmem:[#allocation2] sm:$0xf] %vm258_vm2, %v257_v15 }
 0x199   : > { %v260_v16 = vld [vmem:[#allocation2] sm:$0xf] }
 0x19a   : > { %475 = vmatmul.mubr.msk.bf16.vlgmr.msra.gmra.mrb[0].mxu0 %vm242_vm0, %v260_v16 }
 0x26d   : > { %v322_v18 = vpop.f32.mrb[0].mxu0 }
 0x26e   : > { %v323_v19 = vadd.f32 %v459_v17, %v322_v18  ;;  %v476_v20 = vpop.f32.mrb[1].mxu0 }
 0x26f   : > { %v325_v21 = vpop.f32.mrb[2].mxu0 }
 0x270   : > { %v477_v22 = vpop.f32.mrb[3].mxu0  ;;  %328 = vst.msk [vmem:[%s232_s9] sm:$0xff] %vm242_vm0, %v323_v19 }
 0x271   : > { %630 = shalt.err (!%p627_p5)
}
 0x272   : > { %s631_s21 = scalar_lea.hbm %s907_s29, 128  ;;  %s635_s27 = scalar_lea.hbm %s960_s3, 256 }
 0x273   : > { %p632_p9 = scmp.ne.s32.totalorder %s907_s29, %s631_s21  ;;  %p636_p7 = scmp.lt.u32.totalorder %s907_s29, %s960_s3 }
 0x274   : > { %p637_p3 = scmp.lt.u32.totalorder %s635_s27, %s631_s21  ;;  %p639_p4 = scmp.lt.u32.totalorder %s631_s21, %s907_s29 }
 0x275   : > { %p633_p1 = pnand %p632_p9, %p828_p10 }
 0x276   : > { %p638_p13 = por %p637_p3, %p636_p7 }
 0x277   : > { %p634_p2 = pneg %p633_p1 }
 0x278   : > { %p640_p6 = por %p639_p4, %p638_p13 }
 0x27a   : > { %p641_p8 = pnand %p640_p6, %p634_p2 }
 0x27c   : > { %644 = shalt.err (!%p641_p8)
}
 0x27d   : > { %484 = dma.vmem_to_hbm [thread:$0]  (%p828_p10), %s909_s10, 128, %s907_s29, %s330_s15  }
 0x27e PF: > { %s356_s22 = sand.u32 1, %s683_s12   ;;  %p978_p12 = scmp.ne.s32.totalorder %s968_s23, 0 }
 0x27f   : > { %p979_p11 = scmp.ge.s32.totalorder %s703_s17, 2  ;;  %s357_s24 = scalar_lea.sflag [#allocation5], %s356_s22 }
 0x281   : > { %p495_p0 = pnand %p979_p11, %p978_p12 }
 0x283   : > { %678 = dma.done.wait (!%p495_p0), %s357_s24, 128  }
 0x284   : > { %680 = vsyncadd (!%p495_p0), %s357_s24, 4294967168  ;;  %s20_s17 = sadd.s32 1, %s703_s17   ;;  %s980_s12 = smov %s687_s13 }
 0x285   : > { %p17_p5 = scmp.ge.s32.totalorder %s20_s17, 4   ;;  %s981_s13 = smov %s691_s14 }
 0x286   : > { %s982_s14 = smov %s837_s5  ;;  %s983_s15 = smov %s699_s16 }
 0x287   : > { %s984_s16 = smov %s986_s28  ;;  %19 = sbr.rel (!%p17_p5) target bundleno = 7 (0x7), region = 89 }
 0x28e   :  { %362 = vsyncpa [#allocation4], 1 }
 0x28f   :  { %364 = vsyncpa [#allocation4 + $0x1], 1 }
 0x290   :  { %365 = vsyncpa [#allocation7], 1 }
 0x291   :  { %366 = vsyncpa [#allocation5], 1 }
 0x292   :  { %368 = vsyncpa [#allocation5 + $0x1], 1 }

// kernel: tpu_custom_call.1
= control target key start
LH: loop header
LB: loop body
LE: loop exit
PB: predicated region body
PF: predicated region fallthrough
CT: control target
= control target key end

     0   :  { %8 = vsyncpa [#allocation4], 0  ;;  %s957_s0 = inlined_call_operand.hbm [shape: f32[16,32], index: 0, kind: input, shape index: {}]   ;;  %s958_s1 = inlined_call_operand.hbm [shape: bf16[32,32], index: 1, kind: input, shape index: {}]   ;;  %s959_s2 = inlined_call_operand.vmem [shape: f32[1,32], index: 2, kind: input, shape index: {}]   ;;  %s960_s3 = inlined_call_operand.hbm [shape: f32[16,32], index: 3, kind: output, shape index: {}]  }
   0x1   :  { %10 = vsyncpa [#allocation4 + $0x1], 0 }
   0x2   :  { %11 = vsyncpa [#allocation7], 0 }
   0x3   :  { %12 = vsyncpa [#allocation5], 0 }
   0x4   :  { %14 = vsyncpa [#allocation5 + $0x1], 0  ;;  %s732_s12 = smov 0   ;;  %s734_s13 = smov 0  }
   0x5   :  { %s736_s14 = smov 0   ;;  %s738_s15 = smov 0  }
   0x6   :  { %s740_s16 = smov 0   ;;  %s742_s17 = smov 0  }
   0x7 LB: > { %s447_s18 = sadd.s32 4294967295, %s703_s17   ;;  %s448_s19 = sadd.s32 4294967294, %s703_s17   ;;  %s703_s17 = sphi %s742_s17, %s20_s17   ;;  %s699_s16 = sphi %s740_s16, %s984_s16   ;;  %s695_s15 = sphi %s738_s15, %s983_s15   ;;  %s691_s14 = sphi %s736_s14, %s982_s14   ;;  %s687_s13 = sphi %s734_s13, %s981_s13   ;;  %s683_s12 = sphi %s732_s12, %s980_s12  }
   0x8   : > { %p52_p0 = scmp.ne.s32.totalorder %s687_s13, %s683_s12  ;;  %p766_p1 = scmp.eq.s32.totalorder %s447_s18, 0 }
   0x9   : > { %p770_p2 = scmp.eq.s32.totalorder %s447_s18, 1  ;;  %p136_p3 = scmp.eq.s32.totalorder %s448_s19, 1 }
   0xa   : > { %s965_s20 = scalar_select %p766_p1, 1, 0 }
   0xb   : > { %s966_s21 = scalar_select %p770_p2, 1, 0 }
   0xc   : > { %p776_p4 = por %p766_p1, %p52_p0  ;;  %p449_p5 = scmp.ge.s32.totalorder %s703_s17, 1 }
   0xd   : > { %p781_p6 = por %p136_p3, %p52_p0  ;;  %p143_p7 = scmp.lt.s32.totalorder %s703_s17, 3 }
   0xe   : > { %s967_s22 = scalar_select %p776_p4, 1, 0 }
   0xf   : > { %s968_s23 = scalar_select %p781_p6, 1, 0 }
  0x10   : > { %p786_p8 = pnand %p449_p5, %p143_p7  ;;  %s705_s25 = smov [#allocation6]  }
  0x11   : > { %s157_s26 = sshll.u32 %s705_s25, 4  ;;  %s32_s28 = sadd.s32 1, %s699_s16  ;;  %s158_s26 = int_to_ptr.vmem [resolvable:$true] %s157_s26 }
  0x12   : > { %s969_s24 = scalar_select %p786_p8, 1, 0 }
  0x13   : > { %p486_p9 = pneg %p786_p8  ;;  %s559_s4 = scalar_lea.hbm %s958_s1, 256 }
  0x14   : > { %p560_p12 = scmp.ne.s32.totalorder %s958_s1, %s559_s4  ;;  %p566_p5 = scmp.lt.u32.totalorder %s559_s4, %s958_s1 }
  0x15   : > { %p795_p11 = pnand %p486_p9, %p766_p1 }
  0x17   : > { %p561_p13 = pneg %p795_p11 }
  0x19   : > { %p562_p0 = pnand %p561_p13, %p560_p12 }
  0x1b   : > { %p563_p3 = pneg %p562_p0 }
  0x1d   : > { %p568_p7 = pnand %p566_p5, %p563_p3 }
  0x1f   : > { %571 = shalt.err (!%p568_p7)
}
  0x20   : > { %s572_s9 = scalar_lea.vmem %s158_s26, 256  ;;  %p580_p1 = scmp.lt.s32.totalorder %s158_s26, %s158_s26 }
  0x21   : > { %p573_p9 = scmp.ne.s32.totalorder %s158_s26, %s572_s9  ;;  %p581_p4 = scmp.lt.s32.totalorder %s572_s9, %s572_s9 }
  0x23   : > { %p575_p10 = pnand %p573_p9, %p561_p13  ;;  %p582_p8 = por %p581_p4, %p580_p1 }
  0x25   : > { %p576_p6 = pneg %p575_p10 }
  0x27   : > { %p583_p2 = pnand %p582_p8, %p576_p6 }
  0x29   : > { %586 = shalt.err (!%p583_p2)
}
  0x2a   : > { %s706_s10 = smov 64   ;;  %s707_s11 = smov 4  }
  0x2b   : > { %489 = dma.hbm_to_vmem [thread:$0]  (!%p795_p11), %s958_s1, 256, %s158_s26, [#allocation7], %s706_s10, %s706_s10, %s707_s11  }
  0x2c   : > { %p34_p1 = scmp.ge.s32.totalorder %s32_s28, 2  ;;  %s39_s25 = sadd.s32 1, %s691_s14 }
  0x2d   : > { %p46_p2 = scmp.ne.s32.totalorder %s691_s14, %s687_s13  ;;  %p47_p4 = scmp.eq.s32.totalorder %s703_s17, 0 }
  0x2e   : > { %s986_s28 = smov (%p34_p1, %s32_s28), 0  ;;  %p972_p8 = scmp.ne.s32.totalorder %s966_s21, 0 }
  0x2f   : > { %p822_p6 = por %p47_p4, %p46_p2  ;;  %s36_s27 = ssub.s32 %s699_s16, %s986_s28 }
  0x30   : > { %p828_p10 = por %p972_p8, %p46_p2  ;;  %p499_p12 = scmp.lt.s32.totalorder %s703_s17, 2 }
  0x31   : > { %p37_p11 = scmp.eq.s32.totalorder %s36_s27, 0  ;;  %s177_s26 = sand.u32 1, %s691_s14  }
  0x32   : > { %s453_s4 = sshll.u32 %s177_s26, 3  ;;  %s454_s6 = sshll.u32 %s699_s16, 7 }
  0x33   : > { %s837_s5 = scalar_select %p37_p11, %s691_s14, %s39_s25  }
  0x34   : > { %s843_s9 = scalar_lea.hbm %s957_s0, %s454_s6  ;;  %s181_s21 = scalar_lea.vmem [#allocation3], %s453_s4 }
  0x35   : > { %s188_s10 = sshll.u32 %s181_s21, 4  ;;  %p849_p13 = pnand %p499_p12, %p822_p6  ;;  %s845_s10 = int_to_ptr.vmem [resolvable:$true] %s188_s10 }
  0x36   : > { %s178_s18 = scalar_lea.sflag [#allocation4], %s177_s26  ;;  %s587_s19 = scalar_lea.hbm %s843_s9, 128 }
  0x37   : > { %p588_p0 = scmp.ne.s32.totalorder %s843_s9, %s587_s19  ;;  %p589_p3 = pneg %p849_p13 }
  0x38   : > { %s592_s4 = scalar_lea.hbm %s957_s0, 256  ;;  %p593_p9 = scmp.lt.u32.totalorder %s843_s9, %s957_s0 }
  0x39   : > { %p590_p5 = pnand %p589_p3, %p588_p0  ;;  %p594_p1 = scmp.lt.u32.totalorder %s592_s4, %s587_s19 }
  0x3a   : > { %p596_p4 = scmp.lt.u32.totalorder %s587_s19, %s843_s9 }
  0x3b   : > { %p591_p7 = pneg %p590_p5  ;;  %p595_p2 = por %p594_p1, %p593_p9 }
  0x3d   : > { %p597_p6 = por %p596_p4, %p595_p2 }
  0x3f   : > { %p598_p8 = pnand %p597_p6, %p591_p7 }
  0x41   : > { %601 = shalt.err (!%p598_p8)
}
  0x42   : > { %s602_s26 = scalar_lea.vmem %s845_s10, 128  ;;  %s708_s7 = smov [#allocation3]  }
  0x43   : > { %p603_p12 = scmp.ne.s32.totalorder %s845_s10, %s602_s26  ;;  %s607_s8 = sshll.u32 %s708_s7, 4  ;;  %s608_s8 = int_to_ptr.vmem [resolvable:$false] %s607_s8 }
  0x44   : > { %s609_s21 = scalar_lea.vmem %s608_s8, 256  ;;  %p610_p5 = scmp.lt.s32.totalorder %s845_s10, %s608_s8 }
  0x45   : > { %p605_p11 = pnand %p603_p12, %p589_p3  ;;  %p611_p9 = scmp.lt.s32.totalorder %s609_s21, %s602_s26 }
  0x47   : > { %p606_p0 = pneg %p605_p11  ;;  %p612_p1 = por %p611_p9, %p610_p5 }
  0x49   : > { %p613_p2 = pnand %p612_p1, %p606_p0 }
  0x4b   : > { %616 = shalt.err (!%p613_p2)
}
  0x4c   : > { %493 = dma.hbm_to_vmem [thread:$0]  (!%p849_p13), %s843_s9, 128, %s845_s10, %s178_s18  }
  0x4d   : > { %p975_p7 = scmp.ne.s32.totalorder %s969_s24, 0 }
  0x4e   : > { %s881_s19 = sand.u32 (!%p975_p7), 1, %s687_s13   ;;  %p976_p3 = scmp.ne.s32.totalorder (!%p975_p7), %s967_s22, 0 }
  0x4f   : > { %197 = sbr.rel (%p975_p7) target bundleno = 638 (0x27e), region = 32  ;;  %s456_s25 = sshll.u32 (!%p975_p7), %s881_s19, 3 }
  0x50   : > { %s200_s27 = scalar_lea.sflag (!%p975_p7), [#allocation4], %s881_s19  ;;  %s203_s4 = scalar_lea.vmem (!%p975_p7), [#allocation3], %s456_s25 }
  0x56   : > { %670 = dma.done.wait (%p976_p3), %s200_s27, 128  }
  0x57   : > { %672 = vsyncadd (%p976_p3), %s200_s27, 4294967168  ;;  %p977_p13 = scmp.ne.s32.totalorder %s965_s20, 0 }
  0x59   : > { %674 = dma.done.wait (%p977_p13), [#allocation7], 256  }
  0x5a   : > { %676 = vsyncadd (%p977_p13), [#allocation7], 4294967040  ;;  %vm242_vm0 = vcmask 261120   ;;  %v241_v0 = vld [vmem:[%s203_s4] sm:$0xff]  ;;  %v555_v7 = vld [vmem:[#allocation6] sm:$0xff]   ;;  %v709_v8 = vmov 0.0  }
  0x5b   : > { %v243_v1 = vsel %vm242_vm0, %v241_v0, 0.0  ;;  %470 = vmatprep.subr.bf16.mxu0 %v709_v8  ;;  %v556_v9 = vld [vmem:[#allocation6 + $0x8] sm:$0xff]   ;;  %vm710_vm1 = vmmov 0   ;;  %vm258_vm2 = vcmask 257024   ;;  %s464_s24 = sshll.u32 %s695_s15, 7  ;;  %s232_s9 = scalar_lea.vmem [#allocation8], %s456_s25 }
  0x5c   : > { %244 = vadd.xlane.f32.xlu0 %v243_v1  ;;  %471 = vmatpush3.bf16.msra.mxu0 %v555_v7  ;;  %v459_v17 = vld [vmem:[%s959_s2] ss:$0 sm:$0xff]  ;;  %s344_s10 = sshll.u32 %s232_s9, 4  ;;  %s907_s29 = scalar_lea.hbm %s960_s3, %s464_s24  ;;  %s909_s10 = int_to_ptr.vmem [resolvable:$true] %s344_s10 }
  0x5d   : > { %474 = vmatprep.mubr.msk.bf16.mxu0 %vm710_vm1, %v709_v8  ;;  %472 = vmatprep.subr.bf16.mxu0 %v709_v8  ;;  %s330_s15 = scalar_lea.sflag [#allocation5], %s881_s19  ;;  %s617_s6 = scalar_lea.vmem %s909_s10, 128 }
  0x5e   : > { %p618_p4 = scmp.ne.s32.totalorder %s909_s10, %s617_s6  ;;  %s711_s26 = smov [#allocation8]  }
  0x5f   : > { %s621_s7 = sshll.u32 %s711_s26, 4  ;;  %s622_s7 = int_to_ptr.vmem [resolvable:$false] %s621_s7 }
  0x60   : > { %473 = vmatpush3.bf16.msra.mxu0 %v556_v9  ;;  %p619_p6 = pnand %p618_p4, %p828_p10  ;;  %s623_s8 = scalar_lea.vmem %s622_s7, 256 }
  0x61   : > { %p624_p12 = scmp.lt.s32.totalorder %s909_s10, %s622_s7  ;;  %p625_p11 = scmp.lt.s32.totalorder %s623_s8, %s617_s6 }
  0x62   : > { %p620_p8 = pneg %p619_p6 }
  0x63   : > { %p626_p0 = por %p625_p11, %p624_p12 }
  0x65   : > { %p627_p5 = pnand %p626_p0, %p620_p8 }
  0xe9   : > { %v245_v2 = vpop.xlane.xlu0 %244 }
  0xea   : > { %v247_v3 = vmul.f32 0.03125, %v245_v2 }
  0xec   : > { %v248_v4 = vsub.f32 %v241_v0, %v247_v3 }
  0xee   : > { %v249_v5 = vmul.f32 %v248_v4, %v248_v4 }
  0xf0   : > { %v250_v6 = vsel %vm242_vm0, %v249_v5, 0.0 }
  0xf1   : > { %251 = vadd.xlane.f32.xlu0 %v250_v6 }
 0x17e   : > { %v252_v10 = vpop.xlane.xlu0 %251 }
 0x17f   : > { %v253_v11 = vmul.f32 0.03125, %v252_v10 }
 0x181   : > { %v254_v12 = vadd.f32 1e-05, %v253_v11 }
 0x183   : > { %557 = vrsqrt.f32 %v254_v12 }
 0x18d   : > { %v558_v13 = vpop.eup %557 }
 0x18e   : > { %v256_v14 = vmul.f32 %v558_v13, %v248_v4 }
 0x190   : > { %v257_v15 = vpack.c.bf16 %v256_v14, %v256_v14 }
 0x192   : > { %259 = vst.msk [vmem:[#allocation2] sm:$0xf] %vm258_vm2, %v257_v15 }
 0x199   : > { %v260_v16 = vld [vmem:[#allocation2] sm:$0xf] }
 0x19a   : > { %475 = vmatmul.mubr.msk.bf16.vlgmr.msra.gmra.mrb[0].mxu0 %vm242_vm0, %v260_v16 }
 0x26d   : > { %v322_v18 = vpop.f32.mrb[0].mxu0 }
 0x26e   : > { %v323_v19 = vadd.f32 %v459_v17, %v322_v18  ;;  %v476_v20 = vpop.f32.mrb[1].mxu0 }
 0x26f   : > { %v325_v21 = vpop.f32.mrb[2].mxu0 }
 0x270   : > { %v477_v22 = vpop.f32.mrb[3].mxu0  ;;  %328 = vst.msk [vmem:[%s232_s9] sm:$0xff] %vm242_vm0, %v323_v19 }
 0x271   : > { %630 = shalt.err (!%p627_p5)
}
 0x272   : > { %s631_s21 = scalar_lea.hbm %s907_s29, 128  ;;  %s635_s27 = scalar_lea.hbm %s960_s3, 256 }
 0x273   : > { %p632_p9 = scmp.ne.s32.totalorder %s907_s29, %s631_s21  ;;  %p636_p7 = scmp.lt.u32.totalorder %s907_s29, %s960_s3 }
 0x274   : > { %p637_p3 = scmp.lt.u32.totalorder %s635_s27, %s631_s21  ;;  %p639_p4 = scmp.lt.u32.totalorder %s631_s21, %s907_s29 }
 0x275   : > { %p633_p1 = pnand %p632_p9, %p828_p10 }
 0x276   : > { %p638_p13 = por %p637_p3, %p636_p7 }
 0x277   : > { %p634_p2 = pneg %p633_p1 }
 0x278   : > { %p640_p6 = por %p639_p4, %p638_p13 }
 0x27a   : > { %p641_p8 = pnand %p640_p6, %p634_p2 }
 0x27c   : > { %644 = shalt.err (!%p641_p8)
}
 0x27d   : > { %484 = dma.vmem_to_hbm [thread:$0]  (%p828_p10), %s909_s10, 128, %s907_s29, %s330_s15  }
 0x27e PF: > { %s356_s22 = sand.u32 1, %s683_s12   ;;  %p978_p12 = scmp.ne.s32.totalorder %s968_s23, 0 }
 0x27f   : > { %p979_p11 = scmp.ge.s32.totalorder %s703_s17, 2  ;;  %s357_s24 = scalar_lea.sflag [#allocation5], %s356_s22 }
 0x281   : > { %p495_p0 = pnand %p979_p11, %p978_p12 }
 0x283   : > { %678 = dma.done.wait (!%p495_p0), %s357_s24, 128  }
 0x284   : > { %680 = vsyncadd (!%p495_p0), %s357_s24, 4294967168  ;;  %s20_s17 = sadd.s32 1, %s703_s17   ;;  %s980_s12 = smov %s687_s13 }
 0x285   : > { %p17_p5 = scmp.ge.s32.totalorder %s20_s17, 4   ;;  %s981_s13 = smov %s691_s14 }
 0x286   : > { %s982_s14 = smov %s837_s5  ;;  %s983_s15 = smov %s699_s16 }
 0x287   : > { %s984_s16 = smov %s986_s28  ;;  %19 = sbr.rel (!%p17_p5) target bundleno = 7 (0x7), region = 89 }
 0x28e   :  { %362 = vsyncpa [#allocation4], 1 }
 0x28f   :  { %364 = vsyncpa [#allocation4 + $0x1], 1 }
 0x290   :  { %365 = vsyncpa [#allocation7], 1 }
 0x291   :  { %366 = vsyncpa [#allocation5], 1 }
 0x292   :  { %368 = vsyncpa [#allocation5 + $0x1], 1 }

</bundles_post_ra>
